<compile_context>
chip_gen: v6e
topology: v6e:2x2x1
jax: 0.10.0
libtpu: 0.0.40
codegen_flags: <defaults>
</compile_context>

<pallas_src>
import functools

import jax
import jax.numpy as jnp
from jax.experimental import pallas as pl
from jax.experimental.pallas import tpu as pltpu


def _round_up(x: int, m: int) -> int:
    return (x + m - 1) // m * m


def _sigmoid(z):
    # sigmoid(z) == 0.5 * (tanh(z/2) + 1): one EUP op, f32-safe on all chips.
    return 0.5 * (jnp.tanh(0.5 * z) + 1.0)


def gabp_kernel(x_ref, w1_ref, b1_ref, w2_ref, b2_ref, out_ref):
    # Hidden layer: sigmoid(x @ W1 + b1). Cast x to bf16 in-kernel (VPU, ~free).
    x = x_ref[...].astype(jnp.bfloat16)                       # (TB, F)
    h = jnp.dot(x, w1_ref[...], preferred_element_type=jnp.float32)
    h = _sigmoid(h + b1_ref[...])                             # (TB, H) f32
    # Output layer: sigmoid(h @ W2 + b2); store only the real n_output lanes.
    o = jnp.dot(h.astype(jnp.bfloat16), w2_ref[...],
                preferred_element_type=jnp.float32)           # (TB, O)
    out_ref[...] = _sigmoid(o + b2_ref[...]).astype(out_ref.dtype)


def prepare_params(w_hidden, b_hidden, w_output, b_output):
    """One-time prep: transpose torch-Linear weights to (in, out), cast to bf16.

    Args (torch Linear layout):
      w_hidden: (H, F), b_hidden: (H,), w_output: (O, H), b_output: (O,)
    Returns:
      w1 (F, H) bf16, b1 (1, H) f32, w2 (H, O) bf16, b2 (1, O) f32
    """
    w1 = jnp.asarray(w_hidden, jnp.float32).T.astype(jnp.bfloat16)
    b1 = jnp.asarray(b_hidden, jnp.float32).reshape(1, -1)
    w2 = jnp.asarray(w_output, jnp.float32).T.astype(jnp.bfloat16)
    b2 = jnp.asarray(b_output, jnp.float32).reshape(1, -1)
    return w1, b1, w2, b2


def _choose_batch_tiling(B: int, max_tile: int = 4096):
    """Pick (B_pad, TB) with sublane-aligned tiles, bounded padding waste,
    and >=2 grid steps when possible (v7x megacore)."""
    B8 = _round_up(max(B, 8), 8)
    num_tiles = pl.cdiv(B8, max_tile)
    if num_tiles < 2 and B8 >= 16:
        num_tiles = 2                      # let both v7x TensorCores run
    TB = _round_up(pl.cdiv(B8, num_tiles), 8)
    B_pad = TB * num_tiles
    return B_pad, TB, num_tiles


@jax.jit
def gabp_forward(x, w1, b1, w2, b2):
    """Forward pass matching the torch module. Returns (B, n_output) float32."""
    x = jnp.asarray(x, jnp.float32)
    B, F = x.shape
    H = w1.shape[1]
    O = w2.shape[1]

    B_pad, TB, num_tiles = _choose_batch_tiling(B)
    if B_pad != B:
        x = jnp.pad(x, ((0, B_pad - B), (0, 0)))

    cost = pl.CostEstimate(
        flops=2 * B_pad * (F * H + H * O),
        transcendentals=B_pad * (H + O),
        bytes_accessed=(B_pad * F * 4          # x (f32 in)
                        + F * H * 2 + H * 4    # W1, b1
                        + H * O * 2 + O * 4    # W2, b2
                        + B_pad * O * 4),      # out (unpadded f32)
    )

    out = pl.pallas_call(
        gabp_kernel,
        out_shape=jax.ShapeDtypeStruct((B_pad, O), jnp.float32),
        grid=(num_tiles,),
        in_specs=[
            pl.BlockSpec((TB, F), lambda i: (i, 0)),   # x: tiled over batch
            pl.BlockSpec((F, H), lambda i: (0, 0)),    # W1: VMEM-resident
            pl.BlockSpec((1, H), lambda i: (0, 0)),    # b1
            pl.BlockSpec((H, O), lambda i: (0, 0)),    # W2
            pl.BlockSpec((1, O), lambda i: (0, 0)),    # b2
        ],
        out_specs=pl.BlockSpec((TB, O), lambda i: (i, 0)),
        compiler_params=pltpu.CompilerParams(
            dimension_semantics=("parallel",)),        # megacore batch split
        cost_estimate=cost,
    )(x, w1, b1, w2, b2)

    return out[:B]


def _reference(x, w_hidden, b_hidden, w_output, b_output):
    hid = jax.nn.sigmoid(x @ w_hidden.T + b_hidden)
    return jax.nn.sigmoid(hid @ w_output.T + b_output)


if __name__ == "__main__":
    # Small shapes consistent with the module: n_feature=16, n_hidden=32, n_output=8.
    n_feature, n_hidden, n_output = 16, 32, 8

    key = jax.random.PRNGKey(0)
    kx, k1, k2, k3, k4 = jax.random.split(key, 5)

    # GA_parameter layout: [hidden.weight (H,F), hidden.bias (H,),
    #                       output.weight (O,H), output.bias (O,)]
    w_hidden = jax.random.normal(k1, (n_hidden, n_feature), dtype=jnp.float32) * 0.1
    b_hidden = jax.random.normal(k2, (n_hidden,), dtype=jnp.float32) * 0.1
    w_output = jax.random.normal(k3, (n_output, n_hidden), dtype=jnp.float32) * 0.1
    b_output = jax.random.normal(k4, (n_output,), dtype=jnp.float32) * 0.1
    params = prepare_params(w_hidden, b_hidden, w_output, b_output)

    ok = True
    # Check an aligned tiny batch (grid=(1,)) and a misaligned one (padding +
    # 2 grid steps path).
    for B in (8, 20):
        x = jax.random.normal(jax.random.fold_in(kx, B), (B, n_feature),
                              dtype=jnp.float32)
        out = jax.block_until_ready(gabp_forward(x, *params))
        ref = _reference(x, w_hidden, b_hidden, w_output, b_output)
        assert out.shape == (B, n_output)
        # bf16 matmul inputs with f32 accumulation -> relaxed tolerance.
        ok = ok and bool(jnp.allclose(out, ref, atol=2e-2, rtol=2e-2))

    assert ok, "mismatch vs reference"
    print("KERNEL_OK")
</pallas_src>

<mosaic_0001>
module attributes {stable_mosaic.version = 11 : i64} {
  func.func @gabp_kernel(%arg0: i32, %arg1: memref<8x16xf32, #tpu.memory_space<vmem>>, %arg2: memref<16x32xbf16, #tpu.memory_space<vmem>>, %arg3: memref<1x32xf32, #tpu.memory_space<vmem>>, %arg4: memref<32x8xbf16, #tpu.memory_space<vmem>>, %arg5: memref<1x8xf32, #tpu.memory_space<vmem>>, %arg6: memref<8x8xf32, #tpu.memory_space<vmem>>) attributes {dimension_semantics = [#tpu.dimension_semantics<parallel>], iteration_bounds = array<i64: 1>, scalar_prefetch = 0 : i64, scratch_operands = 0 : i64, tpu.core_type = #tpu.core_type<tc>, window_params = [{transform_indices = @transform_0, window_bounds = array<i64: 8, 16>}, {pipeline_mode = #tpu.pipeline_mode<synchronous>, transform_indices = @transform_1, window_bounds = array<i64: 16, 32>}, {pipeline_mode = #tpu.pipeline_mode<synchronous>, transform_indices = @transform_2, window_bounds = array<i64: 1, 32>}, {pipeline_mode = #tpu.pipeline_mode<synchronous>, transform_indices = @transform_3, window_bounds = array<i64: 32, 8>}, {pipeline_mode = #tpu.pipeline_mode<synchronous>, transform_indices = @transform_4, window_bounds = array<i64: 1, 8>}, {transform_indices = @transform_5, window_bounds = array<i64: 8, 8>}]} {
    %c0 = arith.constant 0 : index
    %c0_0 = arith.constant 0 : index
    %0 = vector.load %arg1[%c0, %c0_0] : memref<8x16xf32, #tpu.memory_space<vmem>>, vector<8x16xf32>
    %1 = arith.truncf %0 : vector<8x16xf32> to vector<8x16xbf16>
    %c0_1 = arith.constant 0 : index
    %c0_2 = arith.constant 0 : index
    %2 = vector.load %arg2[%c0_1, %c0_2] : memref<16x32xbf16, #tpu.memory_space<vmem>>, vector<16x32xbf16>
    %cst = arith.constant dense<0.000000e+00> : vector<8x32xf32>
    %3 = tpu.matmul %1, %2, %cst {dimension_numbers = #tpu.dot_dimension_numbers<[1], [0], [0], [1], [0, 0, 1, 1], [], []>} : vector<8x16xbf16>, vector<16x32xbf16>, vector<8x32xf32> -> vector<8x32xf32>
    %c0_3 = arith.constant 0 : index
    %c0_4 = arith.constant 0 : index
    %4 = vector.load %arg3[%c0_3, %c0_4] : memref<1x32xf32, #tpu.memory_space<vmem>>, vector<1x32xf32>
    %5 = vector.broadcast %4 : vector<1x32xf32> to vector<8x32xf32>
    %6 = arith.addf %3, %5 : vector<8x32xf32>
    %cst_5 = arith.constant 5.000000e-01 : f32
    %7 = vector.broadcast %cst_5 : f32 to vector<8x32xf32>
    %8 = arith.mulf %7, %6 : vector<8x32xf32>
    %9 = math.tanh %8 : vector<8x32xf32>
    %cst_6 = arith.constant 1.000000e+00 : f32
    %10 = vector.broadcast %cst_6 : f32 to vector<8x32xf32>
    %11 = arith.addf %9, %10 : vector<8x32xf32>
    %cst_7 = arith.constant 5.000000e-01 : f32
    %12 = vector.broadcast %cst_7 : f32 to vector<8x32xf32>
    %13 = arith.mulf %12, %11 : vector<8x32xf32>
    %14 = arith.truncf %13 : vector<8x32xf32> to vector<8x32xbf16>
    %c0_8 = arith.constant 0 : index
    %c0_9 = arith.constant 0 : index
    %15 = vector.load %arg4[%c0_8, %c0_9] : memref<32x8xbf16, #tpu.memory_space<vmem>>, vector<32x8xbf16>
    %cst_10 = arith.constant dense<0.000000e+00> : vector<8x8xf32>
    %16 = tpu.matmul %14, %15, %cst_10 {dimension_numbers = #tpu.dot_dimension_numbers<[1], [0], [0], [1], [0, 0, 1, 1], [], []>} : vector<8x32xbf16>, vector<32x8xbf16>, vector<8x8xf32> -> vector<8x8xf32>
    %c0_11 = arith.constant 0 : index
    %c0_12 = arith.constant 0 : index
    %17 = vector.load %arg5[%c0_11, %c0_12] : memref<1x8xf32, #tpu.memory_space<vmem>>, vector<1x8xf32>
    %18 = vector.broadcast %17 : vector<1x8xf32> to vector<8x8xf32>
    %19 = arith.addf %16, %18 : vector<8x8xf32>
    %cst_13 = arith.constant 5.000000e-01 : f32
    %20 = vector.broadcast %cst_13 : f32 to vector<8x8xf32>
    %21 = arith.mulf %20, %19 : vector<8x8xf32>
    %22 = math.tanh %21 : vector<8x8xf32>
    %cst_14 = arith.constant 1.000000e+00 : f32
    %23 = vector.broadcast %cst_14 : f32 to vector<8x8xf32>
    %24 = arith.addf %22, %23 : vector<8x8xf32>
    %cst_15 = arith.constant 5.000000e-01 : f32
    %25 = vector.broadcast %cst_15 : f32 to vector<8x8xf32>
    %26 = arith.mulf %25, %24 : vector<8x8xf32>
    %c0_16 = arith.constant 0 : index
    %c0_17 = arith.constant 0 : index
    %27 = vector.load %arg6[%c0_16, %c0_17] : memref<8x8xf32, #tpu.memory_space<vmem>>, vector<8x8xf32>
    tpu.vector_store %arg6[%c0_16, %c0_17], %26 {strides = array<i32>} : memref<8x8xf32, #tpu.memory_space<vmem>>, vector<8x8xf32>,
    return
  }
  func.func @transform_0(%arg0: i32) -> (i32, i32) {
    %c0_i32 = arith.constant 0 : i32
    %c0_i32_0 = arith.constant 0 : i32
    return %arg0, %c0_i32 : i32, i32
  }
  func.func @transform_1(%arg0: i32) -> (i32, i32) {
    %c0_i32 = arith.constant 0 : i32
    %c0_i32_0 = arith.constant 0 : i32
    %c0_i32_1 = arith.constant 0 : i32
    return %c0_i32, %c0_i32_0 : i32, i32
  }
  func.func @transform_2(%arg0: i32) -> (i32, i32) {
    %c0_i32 = arith.constant 0 : i32
    %c0_i32_0 = arith.constant 0 : i32
    %c0_i32_1 = arith.constant 0 : i32
    return %c0_i32, %c0_i32_0 : i32, i32
  }
  func.func @transform_3(%arg0: i32) -> (i32, i32) {
    %c0_i32 = arith.constant 0 : i32
    %c0_i32_0 = arith.constant 0 : i32
    %c0_i32_1 = arith.constant 0 : i32
    return %c0_i32, %c0_i32_0 : i32, i32
  }
  func.func @transform_4(%arg0: i32) -> (i32, i32) {
    %c0_i32 = arith.constant 0 : i32
    %c0_i32_0 = arith.constant 0 : i32
    %c0_i32_1 = arith.constant 0 : i32
    return %c0_i32, %c0_i32_0 : i32, i32
  }
  func.func @transform_5(%arg0: i32) -> (i32, i32) {
    %c0_i32 = arith.constant 0 : i32
    %c0_i32_0 = arith.constant 0 : i32
    return %arg0, %c0_i32 : i32, i32
  }
}

</mosaic_0001>

<bundles_post_ra>
// kernel: gabp_forward.1
= control target key start
LH: loop header
LB: loop body
LE: loop exit
PB: predicated region body
PF: predicated region fallthrough
CT: control target
= control target key end

     0   :  { %v233_v1 = vmov 0.0   ;;  %vm39_vm0 = vcmask 130048   ;;  %vm234_vm1 = vmmov 0   ;;  %s287_s0 = inlined_call_operand.vmem [shape: f32[8,16], index: 0, kind: input, shape index: {}]   ;;  %s288_s1 = inlined_call_operand.vmem [shape: bf16[16,32], index: 1, kind: input, shape index: {}]   ;;  %s289_s2 = inlined_call_operand.vmem [shape: f32[1,32], index: 2, kind: input, shape index: {}]   ;;  %s290_s3 = inlined_call_operand.vmem [shape: bf16[32,8], index: 3, kind: input, shape index: {}]   ;;  %s291_s4 = inlined_call_operand.vmem [shape: f32[1,8], index: 4, kind: input, shape index: {}]   ;;  %s292_s5 = inlined_call_operand.hbm [shape: f32[8,8], index: 5, kind: output, shape index: {}]  }
   0x1   :  { %v204_v0 = vld [vmem:[%s288_s1] sm:$0xff]   ;;  %187 = vmatprep.subr.bf16.mxu0 %v233_v1  ;;  %193 = vmatprep.subr.bf16.mxu1 %v233_v1 }
   0x2   :  { %v22_v2 = vld [vmem:[%s287_s0] sm:$0xff]  ;;  %188 = vmatpush3.bf16.msra.mxu0 %v204_v0  ;;  %189 = vmatprep.mubr.msk.bf16.mxu0 %vm234_vm1, %v233_v1 }
   0x3   :  { %v23_v3 = vpack.c.bf16 %v22_v2, %v22_v2  ;;  %197 = vmatprep.mubr.msk.bf16.mxu1 %vm234_vm1, %v233_v1 }
   0x4   :  { %10 = vsyncpa [#allocation3], 0  ;;  %v205_v4 = vld [vmem:[%s290_s3 + $0x8] sm:$0xff]   ;;  %v206_v5 = vld [vmem:[%s290_s3] sm:$0xff]   ;;  %vm111_vm2 = vcmask 261120   ;;  %vm159_vm3 = vcmask 64512  }
   0x5   :  { %190 = vmatmul.mubr.msk.bf16.vlgmr.msra.gmra.mxu0 %vm39_vm0, %v23_v3  ;;  %194 = vmatpush3.bf16.msra.mxu1 %v205_v4  ;;  %v175_v6 = vld [vmem:[%s289_s2] ss:$0 sm:$0xff]  ;;  %s235_s2 = smov [#allocation2]  }
   0x6   :  { %195 = vmatprep.subr.bf16.mxu1 %v233_v1  ;;  %v178_v17 = vld [vmem:[%s291_s4] ss:$0 sm:$0xff]  ;;  %s167_s27 = sshll.u32 %s235_s2, 4  ;;  %s168_s27 = int_to_ptr.vmem [resolvable:$true] %s167_s27 }
   0x7   :  { %s211_s28 = scalar_lea.vmem %s168_s27, 128  ;;  %p216_p1 = scmp.lt.s32.totalorder %s168_s27, %s168_s27 }
   0x8   :  { %p212_p0 = scmp.ne.s32.totalorder %s168_s27, %s211_s28  ;;  %p217_p2 = scmp.lt.s32.totalorder %s211_s28, %s211_s28 }
   0x9   :  { %196 = vmatpush3.bf16.msra.mxu1 %v206_v5 }
   0xa   :  { %p218_p3 = por %p217_p2, %p216_p1 }
   0xc   :  { %p219_p4 = pnand %p218_p3, %p212_p0 }
  0xc5   :  { %v77_v7 = vpop.f32.mrf.mxu0 }
  0xc6   :  { %v78_v8 = vadd.f32 %v175_v6, %v77_v7 }
  0xc7   :  { %v191_v9 = vpop.f32.mrf.mxu0 }
  0xc8   :  { %v83_v10 = vmul.f32 0.5, %v78_v8 }
  0xc9   :  { %v80_v11 = vpop.f32.mrf.mxu0 }
  0xca   :  { %207 = vtanh.f32 %v83_v10 }
  0xcb   :  { %v192_v12 = vpop.f32.mrf.mxu0 }
  0xd7   :  { %v208_v13 = vpop.eup %207 }
  0xd8   :  { %v85_v14 = vadd.f32 1.0, %v208_v13 }
  0xda   :  { %v86_v15 = vmul.f32 0.5, %v85_v14 }
  0xdc   :  { %v87_v16 = vpack.c.bf16 %v86_v15, %v86_v15 }
  0xde   :  { %198 = vmatmul.mubr.msk.bf16.vlgmr.msra.gmra.mxu1 %vm111_vm2, %v87_v16 }
 0x19e   :  { %v149_v18 = vpop.f32.mrf.mxu1 }
 0x19f   :  { %v150_v19 = vadd.f32 %v178_v17, %v149_v18 }
 0x1a0   :  { %v199_v20 = vpop.f32.mrf.mxu1 }
 0x1a1   :  { %v155_v21 = vmul.f32 0.5, %v150_v19 }
 0x1a2   :  { %v152_v22 = vpop.f32.mrf.mxu1 }
 0x1a3   :  { %209 = vtanh.f32 %v155_v21 }
 0x1a4   :  { %v200_v23 = vpop.f32.mrf.mxu1 }
 0x1b0   :  { %v210_v24 = vpop.eup %209 }
 0x1b1   :  { %v157_v25 = vadd.f32 1.0, %v210_v24 }
 0x1b3   :  { %v158_v26 = vmul.f32 0.5, %v157_v25 }
 0x1b5   :  { %160 = vst.msk [vmem:[#allocation2] sm:$0xff] %vm159_vm3, %v158_v26 }
 0x1b6   :  { %222 = shalt.err (!%p219_p4)
}
 0x1b7   :  { %170 = dma.vmem_to_hbm [thread:$0]  %s168_s27, 128, %s292_s5, [#allocation3]  }
 0x1b8   :  { %231 = dma.done.wait [#allocation3], 128  }
 0x1b9   :  { %232 = vsyncadd [#allocation3], 4294967168 }
 0x1ba   :  { %174 = vsyncpa [#allocation3], 1 }

</bundles_post_ra>
